<compile_context>
chip_gen: v5e
topology: v5e:2x2
jax: 0.10.0
libtpu: 0.0.40
codegen_flags: <defaults>
</compile_context>

<pallas_src>
import jax
import jax.numpy as jnp
from jax import lax
from jax.experimental import pallas as pl
from jax.experimental.pallas import tpu as pltpu


def _round_up(x, m):
    return (x + m - 1) // m * m


# ---------------------------------------------------------------------------
# Kernel: gather one block of token embeddings from the VMEM-resident table.
#   ids_ref   : (n_pad,)    int32   scalar-prefetched token ids (SMEM)
#   table_ref : (V, E_pad)  f32     embedding table, resident in VMEM
#   out_ref   : (TM, E_pad) f32     gathered rows for this token block
# ---------------------------------------------------------------------------
def embedding_kernel(ids_ref, table_ref, out_ref):
    tm = out_ref.shape[0]
    base = pl.program_id(0) * tm

    def gather_row(i, carry):
        tok = ids_ref[base + i]                                  # scalar from SMEM
        out_ref[pl.ds(i, 1), :] = table_ref[pl.ds(tok, 1), :]    # row copy (1, E_pad)
        return carry

    # unroll=True gives the LLO scheduler visibility over the short row-copy body.
    lax.fori_loop(0, tm, gather_row, 0, unroll=True)


# ---------------------------------------------------------------------------
# Wrapper: full forward pass of Embedin
# ---------------------------------------------------------------------------
def embedin_forward(x, embed_weight, *, tm=256):
    """x: integer array of any shape; embed_weight: (V, E). Returns x.shape+(E,)."""
    V, E = embed_weight.shape
    orig_shape = x.shape
    dtype = embed_weight.dtype
    itemsize = jnp.dtype(dtype).itemsize

    # --- flatten & clamp token ids ----------------------------------------
    ids = x.reshape(-1).astype(jnp.int32)
    # nn.Embedding raises on out-of-range ids; an OOB VMEM read on TPU is
    # undefined, so clamp defensively (documented deviation from torch).
    ids = jnp.clip(ids, 0, V - 1)
    n = ids.shape[0]

    # --- choose token-block size -------------------------------------------
    # Large blocks amortize the ~0.35us/grid-step overhead; cap so there are
    # at least 2 blocks so v7x's two TensorCores can split the batch.
    tm_eff = int(min(tm, max(8, _round_up(pl.cdiv(n, 2), 8))))
    n_blocks = int(pl.cdiv(n, tm_eff))
    n_pad = n_blocks * tm_eff
    if n_pad != n:
        ids = jnp.pad(ids, (0, n_pad - n))          # pad ids gather row 0, sliced off

    # --- lane-dense embedding dim ------------------------------------------
    E_pad = _round_up(E, 128)
    table = embed_weight
    if E_pad != E:
        table = jnp.pad(table, ((0, 0), (0, E_pad - E)))

    # --- VMEM budget & cost hint --------------------------------------------
    table_bytes = V * E_pad * itemsize
    out_blk_bytes = tm_eff * E_pad * itemsize
    # table is double-buffered by the default pipeline (see TODO above), plus
    # double-buffered output blocks, plus headroom.
    vmem_needed = 2 * table_bytes + 2 * out_blk_bytes + (2 << 20)
    vmem_limit = int(min(max(vmem_needed, 16 << 20), 100 << 20))

    cost = pl.CostEstimate(
        flops=0,
        transcendentals=0,
        bytes_accessed=int(table_bytes + n_pad * 4 + n_pad * E_pad * itemsize),
    )

    out = pl.pallas_call(
        embedding_kernel,
        out_shape=jax.ShapeDtypeStruct((n_pad, E_pad), dtype),
        grid_spec=pltpu.PrefetchScalarGridSpec(
            num_scalar_prefetch=1,                                  # token ids -> SMEM
            grid=(n_blocks,),
            in_specs=[
                pl.BlockSpec((V, E_pad), lambda i, ids_ref: (0, 0)),  # table, resident
            ],
            out_specs=pl.BlockSpec((tm_eff, E_pad), lambda i, ids_ref: (i, 0)),
        ),
        compiler_params=pltpu.CompilerParams(
            dimension_semantics=("parallel",),      # split token blocks across TCs (v7x)
            vmem_limit_bytes=vmem_limit,
        ),
        cost_estimate=cost,
    )(ids, table)

    out = out[:n, :E]
    return out.reshape(*orig_shape, E)


# ---------------------------------------------------------------------------
# Pure-JAX reference (for sanity check)
# ---------------------------------------------------------------------------
def reference_forward(x, embed_weight):
    return embed_weight[x]


if __name__ == "__main__":
    # Small shapes consistent with the module: batch=2, seq=8, vocab=64, embed=32.
    B, T, V, E = 2, 8, 64, 32

    key = jax.random.PRNGKey(0)
    k_x, k_w = jax.random.split(key)
    x = jax.random.randint(k_x, (B, T), 0, V, dtype=jnp.int32)
    # nn.Embedding default init: N(0, 1)
    embed_weight = jax.random.normal(k_w, (V, E), jnp.float32)

    out = embedin_forward(x, embed_weight)
    out = jax.block_until_ready(out)

    ref = reference_forward(x, embed_weight)
    assert out.shape == (B, T, E), out.shape
    assert jnp.allclose(out, ref, atol=1e-6, rtol=1e-6), (out, ref)
    print("KERNEL_OK")
</pallas_src>

<mosaic_0001>
module attributes {stable_mosaic.version = 11 : i64} {
  func.func @embedding_kernel(%arg0: i32, %arg1: memref<16xi32, #tpu.memory_space<smem>>, %arg2: memref<64x128xf32, #tpu.memory_space<vmem>>, %arg3: memref<8x128xf32, #tpu.memory_space<vmem>>) attributes {dimension_semantics = [#tpu.dimension_semantics<parallel>], iteration_bounds = array<i64: 2>, scalar_prefetch = 1 : i64, scratch_operands = 0 : i64, tpu.core_type = #tpu.core_type<tc>, window_params = [{pipeline_mode = #tpu.pipeline_mode<synchronous>, transform_indices = @transform_0, window_bounds = array<i64: 64, 128>}, {transform_indices = @transform_1, window_bounds = array<i64: 8, 128>}]} {
    %c8_i32 = arith.constant 8 : i32
    %0 = arith.muli %arg0, %c8_i32 : i32
    %c0_i32 = arith.constant 0 : i32
    %1 = arith.addi %0, %c0_i32 : i32
    %2 = arith.index_cast %1 : i32 to index
    %3 = memref.load %arg1[%2] : memref<16xi32, #tpu.memory_space<smem>>
    %4 = arith.index_cast %3 : i32 to index
    %c0 = arith.constant 0 : index
    %5 = vector.load %arg2[%4, %c0] : memref<64x128xf32, #tpu.memory_space<vmem>>, vector<1x128xf32>
    %6 = arith.index_cast %c0_i32 : i32 to index
    %c0_0 = arith.constant 0 : index
    %7 = vector.load %arg3[%6, %c0_0] : memref<8x128xf32, #tpu.memory_space<vmem>>, vector<1x128xf32>
    tpu.vector_store %arg3[%6, %c0_0], %5 {strides = array<i32>} : memref<8x128xf32, #tpu.memory_space<vmem>>, vector<1x128xf32>,
    %c1_i32 = arith.constant 1 : i32
    %8 = arith.addi %0, %c1_i32 : i32
    %9 = arith.index_cast %8 : i32 to index
    %10 = memref.load %arg1[%9] : memref<16xi32, #tpu.memory_space<smem>>
    %11 = arith.index_cast %10 : i32 to index
    %c0_1 = arith.constant 0 : index
    %12 = vector.load %arg2[%11, %c0_1] : memref<64x128xf32, #tpu.memory_space<vmem>>, vector<1x128xf32>
    %13 = arith.index_cast %c1_i32 : i32 to index
    %c0_2 = arith.constant 0 : index
    %14 = vector.load %arg3[%13, %c0_2] : memref<8x128xf32, #tpu.memory_space<vmem>>, vector<1x128xf32>
    tpu.vector_store %arg3[%13, %c0_2], %12 {strides = array<i32>} : memref<8x128xf32, #tpu.memory_space<vmem>>, vector<1x128xf32>,
    %c2_i32 = arith.constant 2 : i32
    %15 = arith.addi %0, %c2_i32 : i32
    %16 = arith.index_cast %15 : i32 to index
    %17 = memref.load %arg1[%16] : memref<16xi32, #tpu.memory_space<smem>>
    %18 = arith.index_cast %17 : i32 to index
    %c0_3 = arith.constant 0 : index
    %19 = vector.load %arg2[%18, %c0_3] : memref<64x128xf32, #tpu.memory_space<vmem>>, vector<1x128xf32>
    %20 = arith.index_cast %c2_i32 : i32 to index
    %c0_4 = arith.constant 0 : index
    %21 = vector.load %arg3[%20, %c0_4] : memref<8x128xf32, #tpu.memory_space<vmem>>, vector<1x128xf32>
    tpu.vector_store %arg3[%20, %c0_4], %19 {strides = array<i32>} : memref<8x128xf32, #tpu.memory_space<vmem>>, vector<1x128xf32>,
    %c3_i32 = arith.constant 3 : i32
    %22 = arith.addi %0, %c3_i32 : i32
    %23 = arith.index_cast %22 : i32 to index
    %24 = memref.load %arg1[%23] : memref<16xi32, #tpu.memory_space<smem>>
    %25 = arith.index_cast %24 : i32 to index
    %c0_5 = arith.constant 0 : index
    %26 = vector.load %arg2[%25, %c0_5] : memref<64x128xf32, #tpu.memory_space<vmem>>, vector<1x128xf32>
    %27 = arith.index_cast %c3_i32 : i32 to index
    %c0_6 = arith.constant 0 : index
    %28 = vector.load %arg3[%27, %c0_6] : memref<8x128xf32, #tpu.memory_space<vmem>>, vector<1x128xf32>
    tpu.vector_store %arg3[%27, %c0_6], %26 {strides = array<i32>} : memref<8x128xf32, #tpu.memory_space<vmem>>, vector<1x128xf32>,
    %c4_i32 = arith.constant 4 : i32
    %29 = arith.addi %0, %c4_i32 : i32
    %30 = arith.index_cast %29 : i32 to index
    %31 = memref.load %arg1[%30] : memref<16xi32, #tpu.memory_space<smem>>
    %32 = arith.index_cast %31 : i32 to index
    %c0_7 = arith.constant 0 : index
    %33 = vector.load %arg2[%32, %c0_7] : memref<64x128xf32, #tpu.memory_space<vmem>>, vector<1x128xf32>
    %34 = arith.index_cast %c4_i32 : i32 to index
    %c0_8 = arith.constant 0 : index
    %35 = vector.load %arg3[%34, %c0_8] : memref<8x128xf32, #tpu.memory_space<vmem>>, vector<1x128xf32>
    tpu.vector_store %arg3[%34, %c0_8], %33 {strides = array<i32>} : memref<8x128xf32, #tpu.memory_space<vmem>>, vector<1x128xf32>,
    %c5_i32 = arith.constant 5 : i32
    %36 = arith.addi %0, %c5_i32 : i32
    %37 = arith.index_cast %36 : i32 to index
    %38 = memref.load %arg1[%37] : memref<16xi32, #tpu.memory_space<smem>>
    %39 = arith.index_cast %38 : i32 to index
    %c0_9 = arith.constant 0 : index
    %40 = vector.load %arg2[%39, %c0_9] : memref<64x128xf32, #tpu.memory_space<vmem>>, vector<1x128xf32>
    %41 = arith.index_cast %c5_i32 : i32 to index
    %c0_10 = arith.constant 0 : index
    %42 = vector.load %arg3[%41, %c0_10] : memref<8x128xf32, #tpu.memory_space<vmem>>, vector<1x128xf32>
    tpu.vector_store %arg3[%41, %c0_10], %40 {strides = array<i32>} : memref<8x128xf32, #tpu.memory_space<vmem>>, vector<1x128xf32>,
    %c6_i32 = arith.constant 6 : i32
    %43 = arith.addi %0, %c6_i32 : i32
    %44 = arith.index_cast %43 : i32 to index
    %45 = memref.load %arg1[%44] : memref<16xi32, #tpu.memory_space<smem>>
    %46 = arith.index_cast %45 : i32 to index
    %c0_11 = arith.constant 0 : index
    %47 = vector.load %arg2[%46, %c0_11] : memref<64x128xf32, #tpu.memory_space<vmem>>, vector<1x128xf32>
    %48 = arith.index_cast %c6_i32 : i32 to index
    %c0_12 = arith.constant 0 : index
    %49 = vector.load %arg3[%48, %c0_12] : memref<8x128xf32, #tpu.memory_space<vmem>>, vector<1x128xf32>
    tpu.vector_store %arg3[%48, %c0_12], %47 {strides = array<i32>} : memref<8x128xf32, #tpu.memory_space<vmem>>, vector<1x128xf32>,
    %c7_i32 = arith.constant 7 : i32
    %50 = arith.addi %0, %c7_i32 : i32
    %51 = arith.index_cast %50 : i32 to index
    %52 = memref.load %arg1[%51] : memref<16xi32, #tpu.memory_space<smem>>
    %53 = arith.index_cast %52 : i32 to index
    %c0_13 = arith.constant 0 : index
    %54 = vector.load %arg2[%53, %c0_13] : memref<64x128xf32, #tpu.memory_space<vmem>>, vector<1x128xf32>
    %55 = arith.index_cast %c7_i32 : i32 to index
    %c0_14 = arith.constant 0 : index
    %56 = vector.load %arg3[%55, %c0_14] : memref<8x128xf32, #tpu.memory_space<vmem>>, vector<1x128xf32>
    tpu.vector_store %arg3[%55, %c0_14], %54 {strides = array<i32>} : memref<8x128xf32, #tpu.memory_space<vmem>>, vector<1x128xf32>,
    %c8_i32_15 = arith.constant 8 : i32
    return
  }
  func.func @transform_0(%arg0: i32, %arg1: memref<16xi32, #tpu.memory_space<smem>>) -> (i32, i32) {
    %c0_i32 = arith.constant 0 : i32
    %c0_i32_0 = arith.constant 0 : i32
    %c0_i32_1 = arith.constant 0 : i32
    return %c0_i32, %c0_i32_0 : i32, i32
  }
  func.func @transform_1(%arg0: i32, %arg1: memref<16xi32, #tpu.memory_space<smem>>) -> (i32, i32) {
    %c0_i32 = arith.constant 0 : i32
    %c0_i32_0 = arith.constant 0 : i32
    return %arg0, %c0_i32 : i32, i32
  }
}

</mosaic_0001>

<bundles_post_ra>
// kernel: tpu_custom_call.1
= control target key start
LH: loop header
LB: loop body
LE: loop exit
PB: predicated region body
PF: predicated region fallthrough
CT: control target
= control target key end

     0   :  { %s420_s12 = smov [#allocation3]   ;;  %s558_s0 = inlined_call_operand.hbm [shape: s32[16], index: 0, kind: input, shape index: {}]   ;;  %s559_s1 = inlined_call_operand.hbm [shape: f32[64,128], index: 1, kind: input, shape index: {}]   ;;  %s560_s2 = inlined_call_operand.hbm [shape: f32[16,128], index: 2, kind: output, shape index: {}]  }
   0x1   :  { %s8_s11 = sshll.u32 %s558_s0, 4  ;;  %s9_s11 = int_to_ptr.hbm [resolvable:$true] %s8_s11 }
   0x2   :  { %11 = dma.hbm_to_smem %s9_s11, 16, %s420_s12, [#allocation2] }
   0x3   :  { %394 = dma.done.wait [#allocation2], 16 }
   0x4   :  { %395 = vsyncadd [#allocation2], 4294967280 }
   0x5   :  { %14 = sfence }
   0x6   :  { %15 = vsyncpa [#allocation5], 0 }
   0x7   :  { %16 = vsyncpa [#allocation6], 0 }
   0x8   :  { %18 = vsyncpa [#allocation6 + $0x1], 0  ;;  %s442_s13 = smov 0   ;;  %s444_s14 = smov 0  }
   0x9   :  { %s446_s15 = smov 0   ;;  %s448_s16 = smov 0  }
   0xa LB: > { %s463_s0 = sadd.s32 4294967295, %s418_s16   ;;  %s244_s17 = sadd.s32 4294967294, %s418_s16   ;;  %s418_s16 = sphi %s448_s16, %s566_s16   ;;  %s414_s15 = sphi %s446_s15, %s565_s15   ;;  %s410_s14 = sphi %s444_s14, %s564_s14   ;;  %s406_s13 = sphi %s442_s13, %s563_s13  }
   0xb   : > { %s467_s18 = sadd.s32 1, %s418_s16   ;;  %s52_s19 = sadd.s32 1, %s414_s15 }
   0xc   : > { %s49_s20 = ssub.s32 %s418_s16, %s467_s18  ;;  %p62_p0 = scmp.ne.s32.totalorder %s414_s15, %s410_s14 }
   0xd   : > { %p50_p1 = scmp.eq.s32.totalorder %s49_s20, 0  ;;  %p63_p2 = scmp.eq.s32.totalorder %s463_s0, 1 }
   0xe   : > { %p68_p3 = scmp.ne.s32.totalorder %s410_s14, %s406_s13  ;;  %p69_p4 = scmp.eq.s32.totalorder %s244_s17, 1 }
   0xf   : > { %s478_s21 = scalar_select %p50_p1, %s414_s15, %s52_s19  }
  0x10   : > { %p480_p5 = por %p63_p2, %p62_p0  ;;  %p484_p6 = por %p69_p4, %p68_p3 }
  0x11   : > { %p245_p7 = scmp.ge.s32.totalorder %s418_s16, 1  ;;  %p76_p8 = scmp.lt.s32.totalorder %s418_s16, 3 }
  0x12   : > { %p269_p9 = scmp.eq.s32.totalorder %s463_s0, 0  ;;  %s87_s26 = sshll.u32 %s559_s1, 4  ;;  %s88_s26 = int_to_ptr.hbm [resolvable:$true] %s87_s26 }
  0x13   : > { %p77_p10 = pnand %p245_p7, %p76_p8  ;;  %s421_s27 = smov [#allocation4]  }
  0x14   : > { %s89_s28 = sshll.u32 %s421_s27, 4  ;;  %s422_s29 = smov 128   ;;  %s90_s28 = int_to_ptr.vmem [resolvable:$true] %s89_s28 }
  0x15   : > { %p261_p11 = pneg %p77_p10  ;;  %s423_s30 = smov 8  }
  0x16   : > { %105 = sbr.rel (%p77_p10) target bundleno = 55 (0x37), region = 24 }
  0x17   : > { %p262_p12 = pnand %p269_p9, %p261_p11 }
  0x19   : > { %264 = dma.hbm_to_vmem [thread:$0]  (!%p262_p12), %s88_s26, 1024, %s90_s28, [#allocation5], %s422_s29, %s422_s29, %s423_s30  }
  0x1b   : > { %397 = dma.done.wait (%p269_p9), [#allocation5], 1024  }
  0x1c   : > { %399 = vsyncadd (%p269_p9), [#allocation5], 4294966272  ;;  %s118_s3 = sand.u32 1, %s410_s14   ;;  %s502_s4 = sshll.u32 %s463_s0, 3 }
  0x1d   : > { %s249_s5 = sshll.u32 %s118_s3, 3  ;;  %s122_s6 = sld [smem:[#allocation3 + %s502_s4]] }
  0x1e   : > { %s126_s7 = sadd.s32 1, %s502_s4  ;;  %s131_s8 = sadd.s32 2, %s502_s4 }
  0x1f   : > { %s127_s9 = sld [smem:[#allocation3 + %s126_s7]]  ;;  %s136_s10 = sadd.s32 3, %s502_s4 }
  0x20   : > { %s132_s11 = sld [smem:[#allocation3 + %s131_s8]]  ;;  %s141_s12 = sadd.s32 4, %s502_s4 }
  0x21   : > { %s137_s0 = sld [smem:[#allocation3 + %s136_s10]]  ;;  %s146_s17 = sadd.s32 5, %s502_s4 }
  0x22   : > { %s142_s19 = sld [smem:[#allocation3 + %s141_s12]]  ;;  %s151_s25 = sadd.s32 6, %s502_s4 }
  0x23   : > { %s123_s20 = scalar_lea.vmem [#allocation4], %s122_s6  ;;  %s147_s24 = sld [smem:[#allocation3 + %s146_s17]] }
  0x24   : > { %v124_v0 = vld [vmem:[%s123_s20] sm:$0x1]  ;;  %s513_s26 = scalar_lea.vmem [#allocation7], %s249_s5  ;;  %s152_s27 = sld [smem:[#allocation3 + %s151_s25]] }
  0x25   : > { %125 = vst [vmem:[%s513_s26] sm:$0x1] %v124_v0  ;;  %s156_s28 = sadd.s32 7, %s502_s4  ;;  %s128_s30 = scalar_lea.vmem [#allocation4], %s127_s9 }
  0x26   : > { %s157_s29 = sld [smem:[#allocation3 + %s156_s28]]  ;;  %v129_v1 = vld [vmem:[%s128_s30] sm:$0x1]  ;;  %s172_s6 = scalar_lea.hbm %s560_s2, %s502_s4 }
  0x27   : > { %130 = vst [vmem:[%s513_s26 + $0x1] sm:$0x1] %v129_v1  ;;  %s133_s5 = scalar_lea.vmem [#allocation4], %s132_s11  ;;  %s174_s10 = sshll.u32 %s513_s26, 4  ;;  %s175_s10 = int_to_ptr.vmem [resolvable:$true] %s174_s10 }
  0x28   : > { %v134_v2 = vld [vmem:[%s133_s5] sm:$0x1]  ;;  %s138_s12 = scalar_lea.vmem [#allocation4], %s137_s0  ;;  %s143_s17 = scalar_lea.vmem [#allocation4], %s142_s19 }
  0x29   : > { %135 = vst [vmem:[%s513_s26 + $0x2] sm:$0x1] %v134_v2  ;;  %v139_v3 = vld [vmem:[%s138_s12] sm:$0x1]  ;;  %s176_s9 = sshll.u32 %s172_s6, 4  ;;  %s148_s20 = scalar_lea.vmem [#allocation4], %s147_s24  ;;  %s177_s9 = int_to_ptr.hbm [resolvable:$true] %s176_s9 }
  0x2a   : > { %140 = vst [vmem:[%s513_s26 + $0x3] sm:$0x1] %v139_v3  ;;  %v144_v4 = vld [vmem:[%s143_s17] sm:$0x1]  ;;  %s153_s4 = scalar_lea.vmem [#allocation4], %s152_s27  ;;  %s162_s0 = scalar_lea.sflag [#allocation6], %s118_s3 }
  0x2b   : > { %145 = vst [vmem:[%s513_s26 + $0x4] sm:$0x1] %v144_v4  ;;  %v149_v5 = vld [vmem:[%s148_s20] sm:$0x1]  ;;  %s364_s25 = sshra.s32 %s177_s9, 4  ;;  %s370_s30 = scalar_lea.hbm %s560_s2, 16  ;;  %s365_s25 = int_to_ptr.hbm [resolvable:$true] %s364_s25 }
  0x2c   : > { %150 = vst [vmem:[%s513_s26 + $0x5] sm:$0x1] %v149_v5  ;;  %v154_v6 = vld [vmem:[%s153_s4] sm:$0x1]  ;;  %s158_s11 = scalar_lea.vmem [#allocation4], %s157_s29  ;;  %s366_s19 = scalar_lea.hbm %s365_s25, 8 }
  0x2d   : > { %155 = vst [vmem:[%s513_s26 + $0x6] sm:$0x1] %v154_v6  ;;  %v159_v7 = vld [vmem:[%s158_s11] sm:$0x1]  ;;  %p367_p13 = scmp.ne.s32.totalorder %s365_s25, %s366_s19  ;;  %p371_p2 = scmp.lt.s32.totalorder %s365_s25, %s560_s2 }
  0x2e   : > { %160 = vst [vmem:[%s513_s26 + $0x7] sm:$0x1] %v159_v7  ;;  %p372_p3 = scmp.lt.s32.totalorder %s370_s30, %s366_s19 }
  0x2f   : > { %p368_p0 = pnand %p367_p13, %p480_p5 }
  0x30   : > { %p373_p4 = por %p372_p3, %p371_p2 }
  0x31   : > { %p369_p1 = pneg %p368_p0 }
  0x33   : > { %p374_p7 = pnand %p373_p4, %p369_p1 }
  0x35   : > { %377 = shalt.err (!%p374_p7)
}
  0x36   : > { %259 = dma.vmem_to_hbm [thread:$0]  (%p480_p5), %s175_s10, 128, %s177_s9, %s162_s0  }
  0x37 PF: > { %p271_p8 = scmp.ge.s32.totalorder %s418_s16, 2  ;;  %s188_s3 = sand.u32 1, %s406_s13  }
  0x38   : > { %s189_s26 = scalar_lea.sflag [#allocation6], %s188_s3 }
  0x39   : > { %p266_p9 = pnand %p271_p8, %p484_p6 }
  0x3b   : > { %p267_p10 = pneg %p266_p9 }
  0x3d   : > { %401 = dma.done.wait (%p267_p10), %s189_s26, 128  }
  0x3e   : > { %403 = vsyncadd (%p267_p10), %s189_s26, 4294967168  ;;  %p21_p11 = scmp.ge.s32.totalorder %s467_s18, 4   ;;  %s563_s13 = smov %s410_s14 }
  0x3f   : > { %s564_s14 = smov %s414_s15  ;;  %s565_s15 = smov %s478_s21 }
  0x40   : > { %s566_s16 = smov %s467_s18  ;;  %23 = sbr.rel (!%p21_p11) target bundleno = 10 (0xa), region = 69 }
  0x45   :  { %195 = vsyncpa [#allocation5], 1 }
  0x46   :  { %197 = vsyncpa [#allocation5 + $0x1], 1 }
  0x47   :  { %198 = vsyncpa [#allocation6], 1 }
  0x48   :  { %200 = vsyncpa [#allocation6 + $0x1], 1 }

</bundles_post_ra>
